<compile_context>
chip_gen: v7x
topology: tpu7x:2x2x1
jax: 0.10.0
libtpu: 0.0.40
codegen_flags: <defaults>
</compile_context>

<pallas_src>
import functools

import jax
import jax.numpy as jnp
from jax.experimental import pallas as pl
from jax.experimental.pallas import tpu as pltpu


def _cdiv(a, b):
    return -(-a // b)


def _round_up(v, m):
    return ((v + m - 1) // m) * m


def _vmem_budget_bytes(tile, unit, depth):
    """Conservative explicit VMEM budget (review: set it, esp. for v7x)."""
    f32 = 4
    io = 2 * f32 * tile * (2 + 1)                         # double-buffered x^T / out tiles
    weights = f32 * (2 * depth * unit * (unit + 1) + unit * 3 + 1)
    temps = (8 + 2 * min(depth, 4)) * unit * tile * f32   # activation temporaries headroom
    return int(min(max(4 << 20, 2 * (io + weights + temps)), 32 << 20))


def _mlp_kernel(x_ref, w1_ref, b1_ref, wh_ref, bh_ref, w2_ref, b2_ref, o_ref,
                *, depth, use_bf16):
    # x_ref : (2, TM)                 -- batch on the lane axis (lane-dense)
    # w1_ref: (U, 2)   b1_ref: (U, 1)
    # wh_ref: (2*depth, U, U)         -- PyTorch (out, in) order
    # bh_ref: (2*depth, U, 1)
    # w2_ref: (1, U)   b2_ref: (1, 1)
    # o_ref : (1, TM)                 -- lane-dense output slab
    x0 = x_ref[0:1, :]          # (1, TM)
    x1 = x_ref[1:2, :]          # (1, TM)
    w1 = w1_ref[...]            # (U, 2)

    def mm(w, v):
        # MXU matmul; optionally feed bf16 operands (f32 accumulation) on
        # chips with a bf16 MXU/EUP path (v6e/v7x). Default is full f32.
        if use_bf16:
            w = w.astype(jnp.bfloat16)
            v = v.astype(jnp.bfloat16)
        return jnp.dot(w, v, preferred_element_type=jnp.float32)

    def act(z):
        # tanh is the binding (EUP) slot of this kernel; everything else is
        # filler underneath it. Optional bf16 pre-activation halves EUP cost.
        if use_bf16:
            return jnp.tanh(z.astype(jnp.bfloat16)).astype(jnp.float32)
        return jnp.tanh(z)

    # Input layer: K=2 contraction as two broadcast multiply-adds on the VPU
    # (outer-product broadcasts), avoiding a nearly-empty MXU push.
    u = act(w1[:, 0:1] * x0 + w1[:, 1:2] * x1 + b1_ref[...])        # (U, TM)

    # Residual blocks. (U, U) @ (U, TM) matmuls: TM is the MXU's N dimension;
    # biases broadcast along lanes; residual add stays fused in the expression.
    def block(i, u):
        uu = act(mm(wh_ref[2 * i], u) + bh_ref[2 * i])
        return u + act(mm(wh_ref[2 * i + 1], uu) + bh_ref[2 * i + 1])

    if depth <= 4:
        # Small depth: full static unroll (max LLO scheduling freedom).
        for i in range(depth):
            u = block(i, u)
    else:
        # Large depth: bounded live ranges / code size; dynamic first-axis
        # indexing of the stacked weight/bias refs.
        u = jax.lax.fori_loop(0, depth, block, u)

    # Output layer (no activation): (1, U) @ (U, TM) -> lane-dense (1, TM).
    o_ref[...] = mm(w2_ref[...], u) + b2_ref[...]


def neural_network_forward(x, params, *, depth, tile_m=4096, min_grid=2,
                           use_bf16=False):
    """x: (N, 2) float32. Returns (N,) float32 (matches torch.squeeze)."""
    w1, b1, wh, bh, w2, b2 = params
    N = x.shape[0]
    unit = w1.shape[0]

    # Grid-first tiling:
    #   * at least `min_grid` steps so the "parallel" axis can shard across
    #     v7x's two TensorCores (harmless on 1-TC v5e/v6e),
    #   * tile chosen from the grid so padding waste is <128 columns per step.
    grid = max(min_grid, _cdiv(N, tile_m))
    tile = _round_up(_cdiv(N, grid), 128)
    n_pad = grid * tile

    # Layout plumbing in the wrapper: transpose to (2, N) and zero-pad the
    # batch axis up to grid*tile (padded columns are sliced off below).
    x_t = jnp.transpose(x)
    if n_pad != N:
        x_t = jnp.pad(x_t, ((0, 0), (0, n_pad - N)))

    kernel = functools.partial(_mlp_kernel, depth=depth, use_bf16=use_bf16)

    out = pl.pallas_call(
        kernel,
        out_shape=jax.ShapeDtypeStruct((1, n_pad), jnp.float32),
        grid_spec=pltpu.PrefetchScalarGridSpec(
            num_scalar_prefetch=0,
            grid=(grid,),
            in_specs=[
                pl.BlockSpec((2, tile), lambda i: (0, i)),                    # x^T tile
                pl.BlockSpec((unit, 2), lambda i: (0, 0)),                    # w1
                pl.BlockSpec((unit, 1), lambda i: (0, 0)),                    # b1
                pl.BlockSpec((2 * depth, unit, unit), lambda i: (0, 0, 0)),   # wh
                pl.BlockSpec((2 * depth, unit, 1), lambda i: (0, 0, 0)),      # bh
                pl.BlockSpec((1, unit), lambda i: (0, 0)),                    # w2
                pl.BlockSpec((1, 1), lambda i: (0, 0)),                       # b2
            ],
            out_specs=pl.BlockSpec((1, tile), lambda i: (0, i)),
        ),
        compiler_params=pltpu.CompilerParams(
            dimension_semantics=("parallel",),
            vmem_limit_bytes=_vmem_budget_bytes(tile, unit, depth),
        ),
    )(x_t, w1, b1, wh, bh, w2, b2)

    return out[0, :N]


def init_params(key, unit, depth):
    """Deterministic parameter init; PyTorch (out_features, in_features) layout."""
    ks = jax.random.split(key, 6)
    w1 = jax.random.normal(ks[0], (unit, 2), jnp.float32) * 0.5
    b1 = jax.random.normal(ks[1], (unit, 1), jnp.float32) * 0.1
    wh = jax.random.normal(ks[2], (2 * depth, unit, unit), jnp.float32) * (1.0 / unit**0.5)
    bh = jax.random.normal(ks[3], (2 * depth, unit, 1), jnp.float32) * 0.1
    w2 = jax.random.normal(ks[4], (1, unit), jnp.float32) * (1.0 / unit**0.5)
    b2 = jax.random.normal(ks[5], (1, 1), jnp.float32) * 0.1
    return w1, b1, wh, bh, w2, b2


def reference_forward(x, params, *, depth):
    """Pure-JAX reference (mirrors the PyTorch module exactly)."""
    w1, b1, wh, bh, w2, b2 = params
    u = jnp.tanh(x @ w1.T + b1[:, 0])
    for i in range(depth):
        uu = jnp.tanh(u @ wh[2 * i].T + bh[2 * i, :, 0])
        u = u + jnp.tanh(uu @ wh[2 * i + 1].T + bh[2 * i + 1, :, 0])
    return jnp.squeeze(u @ w2.T + b2[:, 0])


if __name__ == "__main__":
    key = jax.random.PRNGKey(0)

    # Case 1: small depth (static-unroll path), tile multiple of 128.
    unit, depth, N = 32, 2, 256
    k_x, k_p, key = jax.random.split(key, 3)
    x = jax.random.uniform(k_x, (N, 2), jnp.float32)
    params = init_params(k_p, unit, depth)
    out = jax.block_until_ready(neural_network_forward(x, params, depth=depth))
    ref = reference_forward(x, params, depth=depth)
    assert out.shape == (N,), out.shape
    assert jnp.allclose(out, ref, atol=1e-5, rtol=1e-5), "mismatch (depth=2)"

    # Case 2: N not a multiple of 128 (exercises grid-first padding) and
    # depth > 4 (exercises the fori_loop path).
    unit2, depth2, N2 = 32, 6, 300
    k_x2, k_p2, key = jax.random.split(key, 3)
    x2 = jax.random.uniform(k_x2, (N2, 2), jnp.float32)
    params2 = init_params(k_p2, unit2, depth2)
    out2 = jax.block_until_ready(neural_network_forward(x2, params2, depth=depth2))
    ref2 = reference_forward(x2, params2, depth=depth2)
    assert out2.shape == (N2,), out2.shape
    assert jnp.allclose(out2, ref2, atol=1e-5, rtol=1e-5), "mismatch (depth=6)"

    print("KERNEL_OK")
</pallas_src>

<mosaic_0001>
module attributes {stable_mosaic.version = 11 : i64} {
  func.func @_mlp_kernel(%arg0: i32, %arg1: memref<2x128xf32, #tpu.memory_space<vmem>>, %arg2: memref<32x2xf32, #tpu.memory_space<vmem>>, %arg3: memref<32x1xf32, #tpu.memory_space<vmem>>, %arg4: memref<4x32x32xf32, #tpu.memory_space<vmem>>, %arg5: memref<4x32x1xf32, #tpu.memory_space<vmem>>, %arg6: memref<1x32xf32, #tpu.memory_space<vmem>>, %arg7: memref<1x1xf32, #tpu.memory_space<vmem>>, %arg8: memref<1x128xf32, #tpu.memory_space<vmem>>) attributes {dimension_semantics = [#tpu.dimension_semantics<parallel>], iteration_bounds = array<i64: 2>, scalar_prefetch = 0 : i64, scratch_operands = 0 : i64, tpu.core_type = #tpu.core_type<tc>, window_params = [{transform_indices = @transform_0, window_bounds = array<i64: 2, 128>}, {pipeline_mode = #tpu.pipeline_mode<synchronous>, transform_indices = @transform_1, window_bounds = array<i64: 32, 2>}, {pipeline_mode = #tpu.pipeline_mode<synchronous>, transform_indices = @transform_2, window_bounds = array<i64: 32, 1>}, {pipeline_mode = #tpu.pipeline_mode<synchronous>, transform_indices = @transform_3, window_bounds = array<i64: 4, 32, 32>}, {pipeline_mode = #tpu.pipeline_mode<synchronous>, transform_indices = @transform_4, window_bounds = array<i64: 4, 32, 1>}, {pipeline_mode = #tpu.pipeline_mode<synchronous>, transform_indices = @transform_5, window_bounds = array<i64: 1, 32>}, {pipeline_mode = #tpu.pipeline_mode<synchronous>, transform_indices = @transform_6, window_bounds = array<i64: 1, 1>}, {transform_indices = @transform_7, window_bounds = array<i64: 1, 128>}]} {
    %c0 = arith.constant 0 : index
    %c0_0 = arith.constant 0 : index
    %0 = vector.load %arg1[%c0, %c0_0] : memref<2x128xf32, #tpu.memory_space<vmem>>, vector<1x128xf32>
    %c1 = arith.constant 1 : index
    %c0_1 = arith.constant 0 : index
    %1 = vector.load %arg1[%c1, %c0_1] : memref<2x128xf32, #tpu.memory_space<vmem>>, vector<1x128xf32>
    %c0_2 = arith.constant 0 : index
    %c0_3 = arith.constant 0 : index
    %2 = vector.load %arg2[%c0_2, %c0_3] : memref<32x2xf32, #tpu.memory_space<vmem>>, vector<32x2xf32>
    %3 = vector.extract_strided_slice %2 {offsets = [0, 0], sizes = [32, 1], strides = [1, 1]} : vector<32x2xf32> to vector<32x1xf32>
    %4 = vector.broadcast %3 : vector<32x1xf32> to vector<32x128xf32>
    %5 = vector.broadcast %0 : vector<1x128xf32> to vector<32x128xf32>
    %6 = arith.mulf %4, %5 : vector<32x128xf32>
    %7 = vector.extract_strided_slice %2 {offsets = [0, 1], sizes = [32, 1], strides = [1, 1]} : vector<32x2xf32> to vector<32x1xf32>
    %8 = vector.broadcast %7 : vector<32x1xf32> to vector<32x128xf32>
    %9 = vector.broadcast %1 : vector<1x128xf32> to vector<32x128xf32>
    %10 = arith.mulf %8, %9 : vector<32x128xf32>
    %11 = arith.addf %6, %10 : vector<32x128xf32>
    %c0_4 = arith.constant 0 : index
    %c0_5 = arith.constant 0 : index
    %12 = vector.load %arg3[%c0_4, %c0_5] : memref<32x1xf32, #tpu.memory_space<vmem>>, vector<32x1xf32>
    %13 = vector.broadcast %12 : vector<32x1xf32> to vector<32x128xf32>
    %14 = arith.addf %11, %13 : vector<32x128xf32>
    %15 = math.tanh %14 : vector<32x128xf32>
    %c0_6 = arith.constant 0 : index
    %c0_7 = arith.constant 0 : index
    %c0_8 = arith.constant 0 : index
    %16 = vector.load %arg4[%c0_6, %c0_7, %c0_8] : memref<4x32x32xf32, #tpu.memory_space<vmem>>, vector<1x32x32xf32>
    %17 = vector.shape_cast %16 : vector<1x32x32xf32> to vector<32x32xf32>
    %cst = arith.constant dense<0.000000e+00> : vector<32x128xf32>
    %18 = tpu.matmul %17, %15, %cst {dimension_numbers = #tpu.dot_dimension_numbers<[1], [0], [0], [1], [0, 0, 1, 1], [], []>} : vector<32x32xf32>, vector<32x128xf32>, vector<32x128xf32> -> vector<32x128xf32>
    %c0_9 = arith.constant 0 : index
    %c0_10 = arith.constant 0 : index
    %c0_11 = arith.constant 0 : index
    %19 = vector.load %arg5[%c0_9, %c0_10, %c0_11] : memref<4x32x1xf32, #tpu.memory_space<vmem>>, vector<1x32x1xf32>
    %20 = vector.shape_cast %19 : vector<1x32x1xf32> to vector<32x1xf32>
    %21 = vector.broadcast %20 : vector<32x1xf32> to vector<32x128xf32>
    %22 = arith.addf %18, %21 : vector<32x128xf32>
    %23 = math.tanh %22 : vector<32x128xf32>
    %c1_12 = arith.constant 1 : index
    %c0_13 = arith.constant 0 : index
    %c0_14 = arith.constant 0 : index
    %24 = vector.load %arg4[%c1_12, %c0_13, %c0_14] : memref<4x32x32xf32, #tpu.memory_space<vmem>>, vector<1x32x32xf32>
    %25 = vector.shape_cast %24 : vector<1x32x32xf32> to vector<32x32xf32>
    %cst_15 = arith.constant dense<0.000000e+00> : vector<32x128xf32>
    %26 = tpu.matmul %25, %23, %cst_15 {dimension_numbers = #tpu.dot_dimension_numbers<[1], [0], [0], [1], [0, 0, 1, 1], [], []>} : vector<32x32xf32>, vector<32x128xf32>, vector<32x128xf32> -> vector<32x128xf32>
    %c1_16 = arith.constant 1 : index
    %c0_17 = arith.constant 0 : index
    %c0_18 = arith.constant 0 : index
    %27 = vector.load %arg5[%c1_16, %c0_17, %c0_18] : memref<4x32x1xf32, #tpu.memory_space<vmem>>, vector<1x32x1xf32>
    %28 = vector.shape_cast %27 : vector<1x32x1xf32> to vector<32x1xf32>
    %29 = vector.broadcast %28 : vector<32x1xf32> to vector<32x128xf32>
    %30 = arith.addf %26, %29 : vector<32x128xf32>
    %31 = math.tanh %30 : vector<32x128xf32>
    %32 = arith.addf %15, %31 : vector<32x128xf32>
    %c2 = arith.constant 2 : index
    %c0_19 = arith.constant 0 : index
    %c0_20 = arith.constant 0 : index
    %33 = vector.load %arg4[%c2, %c0_19, %c0_20] : memref<4x32x32xf32, #tpu.memory_space<vmem>>, vector<1x32x32xf32>
    %34 = vector.shape_cast %33 : vector<1x32x32xf32> to vector<32x32xf32>
    %cst_21 = arith.constant dense<0.000000e+00> : vector<32x128xf32>
    %35 = tpu.matmul %34, %32, %cst_21 {dimension_numbers = #tpu.dot_dimension_numbers<[1], [0], [0], [1], [0, 0, 1, 1], [], []>} : vector<32x32xf32>, vector<32x128xf32>, vector<32x128xf32> -> vector<32x128xf32>
    %c2_22 = arith.constant 2 : index
    %c0_23 = arith.constant 0 : index
    %c0_24 = arith.constant 0 : index
    %36 = vector.load %arg5[%c2_22, %c0_23, %c0_24] : memref<4x32x1xf32, #tpu.memory_space<vmem>>, vector<1x32x1xf32>
    %37 = vector.shape_cast %36 : vector<1x32x1xf32> to vector<32x1xf32>
    %38 = vector.broadcast %37 : vector<32x1xf32> to vector<32x128xf32>
    %39 = arith.addf %35, %38 : vector<32x128xf32>
    %40 = math.tanh %39 : vector<32x128xf32>
    %c3 = arith.constant 3 : index
    %c0_25 = arith.constant 0 : index
    %c0_26 = arith.constant 0 : index
    %41 = vector.load %arg4[%c3, %c0_25, %c0_26] : memref<4x32x32xf32, #tpu.memory_space<vmem>>, vector<1x32x32xf32>
    %42 = vector.shape_cast %41 : vector<1x32x32xf32> to vector<32x32xf32>
    %cst_27 = arith.constant dense<0.000000e+00> : vector<32x128xf32>
    %43 = tpu.matmul %42, %40, %cst_27 {dimension_numbers = #tpu.dot_dimension_numbers<[1], [0], [0], [1], [0, 0, 1, 1], [], []>} : vector<32x32xf32>, vector<32x128xf32>, vector<32x128xf32> -> vector<32x128xf32>
    %c3_28 = arith.constant 3 : index
    %c0_29 = arith.constant 0 : index
    %c0_30 = arith.constant 0 : index
    %44 = vector.load %arg5[%c3_28, %c0_29, %c0_30] : memref<4x32x1xf32, #tpu.memory_space<vmem>>, vector<1x32x1xf32>
    %45 = vector.shape_cast %44 : vector<1x32x1xf32> to vector<32x1xf32>
    %46 = vector.broadcast %45 : vector<32x1xf32> to vector<32x128xf32>
    %47 = arith.addf %43, %46 : vector<32x128xf32>
    %48 = math.tanh %47 : vector<32x128xf32>
    %49 = arith.addf %32, %48 : vector<32x128xf32>
    %c0_31 = arith.constant 0 : index
    %c0_32 = arith.constant 0 : index
    %50 = vector.load %arg6[%c0_31, %c0_32] : memref<1x32xf32, #tpu.memory_space<vmem>>, vector<1x32xf32>
    %cst_33 = arith.constant dense<0.000000e+00> : vector<1x128xf32>
    %51 = tpu.matmul %50, %49, %cst_33 {dimension_numbers = #tpu.dot_dimension_numbers<[1], [0], [0], [1], [0, 0, 1, 1], [], []>} : vector<1x32xf32>, vector<32x128xf32>, vector<1x128xf32> -> vector<1x128xf32>
    %c0_34 = arith.constant 0 : index
    %c0_35 = arith.constant 0 : index
    %52 = vector.load %arg7[%c0_34, %c0_35] : memref<1x1xf32, #tpu.memory_space<vmem>>, vector<1x1xf32>
    %53 = vector.broadcast %52 : vector<1x1xf32> to vector<1x128xf32>
    %54 = arith.addf %51, %53 : vector<1x128xf32>
    %c0_36 = arith.constant 0 : index
    %c0_37 = arith.constant 0 : index
    %55 = vector.load %arg8[%c0_36, %c0_37] : memref<1x128xf32, #tpu.memory_space<vmem>>, vector<1x128xf32>
    tpu.vector_store %arg8[%c0_36, %c0_37], %54 {strides = array<i32>} : memref<1x128xf32, #tpu.memory_space<vmem>>, vector<1x128xf32>,
    return
  }
  func.func @transform_0(%arg0: i32) -> (i32, i32) {
    %c0_i32 = arith.constant 0 : i32
    %c0_i32_0 = arith.constant 0 : i32
    return %c0_i32, %arg0 : i32, i32
  }
  func.func @transform_1(%arg0: i32) -> (i32, i32) {
    %c0_i32 = arith.constant 0 : i32
    %c0_i32_0 = arith.constant 0 : i32
    %c0_i32_1 = arith.constant 0 : i32
    return %c0_i32, %c0_i32_0 : i32, i32
  }
  func.func @transform_2(%arg0: i32) -> (i32, i32) {
    %c0_i32 = arith.constant 0 : i32
    %c0_i32_0 = arith.constant 0 : i32
    %c0_i32_1 = arith.constant 0 : i32
    return %c0_i32, %c0_i32_0 : i32, i32
  }
  func.func @transform_3(%arg0: i32) -> (i32, i32, i32) {
    %c0_i32 = arith.constant 0 : i32
    %c0_i32_0 = arith.constant 0 : i32
    %c0_i32_1 = arith.constant 0 : i32
    %c0_i32_2 = arith.constant 0 : i32
    return %c0_i32, %c0_i32_0, %c0_i32_1 : i32, i32, i32
  }
  func.func @transform_4(%arg0: i32) -> (i32, i32, i32) {
    %c0_i32 = arith.constant 0 : i32
    %c0_i32_0 = arith.constant 0 : i32
    %c0_i32_1 = arith.constant 0 : i32
    %c0_i32_2 = arith.constant 0 : i32
    return %c0_i32, %c0_i32_0, %c0_i32_1 : i32, i32, i32
  }
  func.func @transform_5(%arg0: i32) -> (i32, i32) {
    %c0_i32 = arith.constant 0 : i32
    %c0_i32_0 = arith.constant 0 : i32
    %c0_i32_1 = arith.constant 0 : i32
    return %c0_i32, %c0_i32_0 : i32, i32
  }
  func.func @transform_6(%arg0: i32) -> (i32, i32) {
    %c0_i32 = arith.constant 0 : i32
    %c0_i32_0 = arith.constant 0 : i32
    %c0_i32_1 = arith.constant 0 : i32
    return %c0_i32, %c0_i32_0 : i32, i32
  }
  func.func @transform_7(%arg0: i32) -> (i32, i32) {
    %c0_i32 = arith.constant 0 : i32
    %c0_i32_0 = arith.constant 0 : i32
    return %c0_i32, %arg0 : i32, i32
  }
}

</mosaic_0001>

<bundles_post_ra>
// kernel: tpu_custom_call.1
= control target key start
LH: loop header
LB: loop body
LE: loop exit
PB: predicated region body
PF: predicated region fallthrough
CT: control target
= control target key end

     0   :  { %s1721_s0 = inlined_call_operand.vmem [shape: f32[2,256], index: 0, kind: input, shape index: {}]   ;;  %s1722_s1 = inlined_call_operand.vmem [shape: f32[32,2], index: 1, kind: input, shape index: {}]   ;;  %s1723_s2 = inlined_call_operand.vmem [shape: f32[32,1], index: 2, kind: input, shape index: {}]   ;;  %s1724_s3 = inlined_call_operand.vmem [shape: f32[4,32,32], index: 3, kind: input, shape index: {}]   ;;  %s1725_s4 = inlined_call_operand.vmem [shape: f32[4,32,1], index: 4, kind: input, shape index: {}]   ;;  %s1726_s5 = inlined_call_operand.vmem [shape: f32[1,32], index: 5, kind: input, shape index: {}]   ;;  %s1727_s6 = inlined_call_operand.<no memory space> [shape: f32[1,1], index: 6, kind: input, shape index: {}]   ;;  %s1728_s7 = inlined_call_operand.hbm [shape: f32[1,256], index: 7, kind: output, shape index: {}]  }
   0x1   :  { %v12_v0 = vstv %s1727_s6 }
   0x2   :  { %13 = vst [vmem:[#allocation2] sm:$0x1] %v12_v0 }
   0x3   :  { %14 = vsyncpa [#allocation4], 0 }
   0x4   :  { %16 = vsyncpa [#allocation4 + $0x1], 0  ;;  %s1449_s26 = smov 0   ;;  %s1451_s27 = smov 0  }
   0x5   :  { %s1453_s28 = smov 0   ;;  %s1455_s29 = smov 0  }
   0x6 LB: > { %s1470_s6 = sadd.s32 4294967295, %s1398_s29   ;;  %s1053_s30 = sadd.s32 4294967294, %s1398_s29   ;;  %s1398_s29 = sphi %s1455_s29, %s1734_s29   ;;  %s1394_s28 = sphi %s1453_s28, %s1733_s28   ;;  %s1390_s27 = sphi %s1451_s27, %s1732_s27   ;;  %s1386_s26 = sphi %s1449_s26, %s1731_s26  }
   0x7   : > { %s1474_s8 = sadd.s32 1, %s1398_s29   ;;  %s181_s9 = sadd.s32 1, %s1394_s28 }
   0x8   : > { %s178_s10 = ssub.s32 %s1398_s29, %s1474_s8  ;;  %p191_p0 = scmp.ne.s32.totalorder %s1394_s28, %s1390_s27 }
   0x9   : > { %p179_p1 = scmp.eq.s32.totalorder %s178_s10, 0  ;;  %p192_p2 = scmp.eq.s32.totalorder %s1470_s6, 1 }
   0xa   : > { %p197_p3 = scmp.ne.s32.totalorder %s1390_s27, %s1386_s26  ;;  %p198_p4 = scmp.eq.s32.totalorder %s1053_s30, 1 }
   0xb   : > { %s1485_s11 = scalar_select %p179_p1, %s1394_s28, %s181_s9  }
   0xc   : > { %p1487_p5 = por %p192_p2, %p191_p0  ;;  %p1491_p6 = por %p198_p4, %p197_p3 }
   0xd   : > { %p1056_p7 = scmp.ge.s32.totalorder %s1398_s29, 1  ;;  %p241_p8 = scmp.lt.s32.totalorder %s1398_s29, 3 }
   0xf   : > { %p242_p9 = pnand %p1056_p7, %p241_p8 }
  0x10   : > { %v279_v1 = vld [vmem:[%s1722_s1 + $0x10] sm:$0xff] (!%p242_p9)  ;;  %v277_v2 = vld [vmem:[%s1722_s1] sm:$0xff] (!%p242_p9)  ;;  %v1400_v3 = vmov (!%p242_p9), 1   ;;  %v278_v4 = vld [vmem:[%s1722_s1 + $0x8] sm:$0xff] (!%p242_p9)  ;;  %v1401_v5 = vmov (!%p242_p9), 0   ;;  %vm397_vm0 = vcmask (!%p242_p9), 261120  }
  0x11   : > { %245 = sbr.rel (%p242_p9) target bundleno = 1367 (0x557), region = 48  ;;  %1292 = vset.pattern.permute.xlu0 (!%p242_p9), %v1400_v3  ;;  %1290 = vset.pattern.permute.xlu1 (!%p242_p9), %v1400_v3  ;;  %v280_v6 = vld [vmem:[%s1722_s1 + $0x18] sm:$0xff] (!%p242_p9)  ;;  %v338_v7 = vld [vmem:[%s1723_s2 + $0x8] sm:$0xff] (!%p242_p9)  ;;  %v337_v8 = vld [vmem:[%s1723_s2] sm:$0xff] (!%p242_p9)  ;;  %p271_p10 = scmp.lt.s32.totalorder (!%p242_p9), %s1470_s6, 1  ;;  %vm1403_vm1 = vmmov (!%p242_p9), 0  }
  0x12   : > { %318 = vperm.xlu0 (!%p242_p9), %1292, %v279_v1   ;;  %310 = vperm.xlu1 (!%p242_p9), %1290, %v277_v2   ;;  %v373_v9 = vld [vmem:[%s1725_s4] sm:$0xff] (!%p242_p9)  ;;  %v339_v10 = vld [vmem:[%s1723_s2 + $0x10] sm:$0xff] (!%p242_p9)  ;;  %v340_v12 = vld [vmem:[%s1723_s2 + $0x18] sm:$0xff] (!%p242_p9)  ;;  %s269_s30 = sand.u32 (!%p242_p9), 1, %s1390_s27   ;;  %s1101_s9 = sshll.u32 (!%p242_p9), %s1470_s6, 4 }
  0x13   : > { %v375_v11 = vld [vmem:[%s1725_s4 + $0x10] sm:$0xff] (!%p242_p9)  ;;  %v1068_v13 = vld [vmem:[%s1725_s4 + $0x20] sm:$0xff] (!%p242_p9)  ;;  %v374_v14 = vld [vmem:[%s1725_s4 + $0x8] sm:$0xff] (!%p242_p9)  ;;  %s270_s10 = scalar_lea.vmem (!%p242_p9), [#allocation3], %s269_s30  ;;  %s1679_s17 = scalar_lea.hbm (!%p242_p9), %s1728_s7, %s1101_s9 }
  0x14   : > { %v1070_v15 = vld [vmem:[%s1725_s4 + $0x30] sm:$0xff] (!%p242_p9)  ;;  %v376_v16 = vld [vmem:[%s1725_s4 + $0x18] sm:$0xff] (!%p242_p9)  ;;  %v1080_v17 = vld [vmem:[%s1725_s4 + $0x40] sm:$0xff] (!%p242_p9)  ;;  %s998_s14 = sshll.u32 (!%p242_p9), %s270_s10, 4  ;;  %s986_s18 = scalar_lea.sflag (!%p242_p9), [#allocation4], %s269_s30  ;;  %s1681_s14 = int_to_ptr.vmem [resolvable:$true] %s998_s14 }
  0x15   : > { %v1069_v18 = vld [vmem:[%s1725_s4 + $0x28] sm:$0xff] (!%p242_p9)  ;;  %v1082_v19 = vld [vmem:[%s1725_s4 + $0x50] sm:$0xff] (!%p242_p9)  ;;  %v1071_v20 = vld [vmem:[%s1725_s4 + $0x38] sm:$0xff] (!%p242_p9) }
  0x16   : > { %1293 = vset.pattern.permute.xlu0 (!%p242_p9), %v1401_v5  ;;  %314 = vperm.xlu1 (!%p242_p9), %1290, %v278_v4   ;;  %v1092_v21 = vld [vmem:[%s1725_s4 + $0x60] sm:$0xff] (!%p242_p9)  ;;  %v1081_v22 = vld [vmem:[%s1725_s4 + $0x48] sm:$0xff] (!%p242_p9)  ;;  %v1094_v24 = vld [vmem:[%s1725_s4 + $0x70] sm:$0xff] (!%p242_p9) }
  0x17   : > { %283 = vperm.xlu0 (!%p242_p9), %1293, %v277_v2   ;;  %v369_v23 = vld [vmem:[%s1724_s3] sm:$0xff] (!%p242_p9)  ;;  %v1083_v25 = vld [vmem:[%s1725_s4 + $0x58] sm:$0xff] (!%p242_p9)  ;;  %v1093_v27 = vld [vmem:[%s1725_s4 + $0x68] sm:$0xff] (!%p242_p9) }
  0x18   : > { %1149 = vmatprep.mubr.msk.f32.mxu0 %vm397_vm0, %v369_v23  ;;  %v901_v26 = vld [vmem:[#allocation2] sm:$0x1]  ;;  %v1095_v28 = vld [vmem:[%s1725_s4 + $0x78] sm:$0xff]  ;;  %s272_s19 = scalar_select %p271_p10, %s1470_s6, 1  ;;  %v371_v2 = vld [vmem:[%s1724_s3 + $0x10] sm:$0xff] }
  0x19   : > { %v1065_v23 = vld [vmem:[%s1724_s3 + $0x28] sm:$0xff]  ;;  %s1405_s6 = smov [#allocation3]  }
  0x1a   : > { %1291 = vset.pattern.permute.xlu1 %v1401_v5  ;;  %s1057_s20 = sshll.u32 %s272_s19, 1  ;;  %s1336_s19 = scalar_lea.vmem %s1681_s14, 16 }
  0x1b   : > { %288 = vperm.xlu0 %1293, %v278_v4   ;;  %298 = vperm.xlu1 %1291, %v280_v6   ;;  %s274_s23 = scalar_lea.vmem %s1721_s0, %s1057_s20  ;;  %v1064_v4 = vld [vmem:[%s1724_s3 + $0x20] sm:$0xff]  ;;  %p1337_p11 = scmp.ne.s32.totalorder %s1681_s14, %s1336_s19 }
  0x1c   : > { %v1058_v35 = vld [vmem:[%s274_s23] ss:$0 sm:$0xff]  ;;  %v1059_v37 = vld [vmem:[%s274_s23 + $0x1] ss:$0 sm:$0xff]  ;;  %1163 = vmatprep.mubr.msk.f32.mxu1 %vm397_vm0, %v1064_v4  ;;  %s1340_s20 = sshll.u32 %s1405_s6, 4  ;;  %s1341_s20 = int_to_ptr.vmem [resolvable:$false] %s1340_s20 }
  0x1d   : > { %p1338_p12 = pnand %p1337_p11, %p1487_p5  ;;  %s1342_s21 = scalar_lea.vmem %s1341_s20, 32 }
  0x1e   : > { %p1343_p0 = scmp.lt.s32.totalorder %s1681_s14, %s1341_s20  ;;  %p1344_p1 = scmp.lt.s32.totalorder %s1342_s21, %s1336_s19 }
  0x1f   : > { %293 = vperm.xlu0 %1293, %v279_v1   ;;  %1294 = vset.pattern.permute.xlu1 %v1400_v3  ;;  %v370_v1 = vld [vmem:[%s1724_s3 + $0x8] sm:$0xff]  ;;  %v372_v3 = vld [vmem:[%s1724_s3 + $0x18] sm:$0xff]  ;;  %p1339_p13 = pneg %p1338_p12 }
  0x20   : > { %322 = vperm.xlu1 %1294, %v280_v6   ;;  %p1345_p2 = por %p1344_p1, %p1343_p0 }
  0x22   : > { %p1346_p3 = pnand %p1345_p2, %p1339_p13 }
  0x23   : > { %348 = vperm.xlu0 %1293, %v338_v7  }
  0x24   : > { %1295 = vset.pattern.permute.xlu1 %v1401_v5 }
  0x25   : > { %343 = vperm.xlu1 %1295, %v337_v8  }
  0x27   : > { %379 = vperm.xlu0 %1293, %v373_v9  }
  0x29   : > { %353 = vperm.xlu1 %1295, %v339_v10  }
  0x2b   : > { %389 = vperm.xlu0 %1293, %v375_v11  }
  0x2d   : > { %358 = vperm.xlu1 %1295, %v340_v12  }
  0x2f   : > { %511 = vperm.xlu0 %1293, %v1068_v13  }
  0x31   : > { %384 = vperm.xlu1 %1295, %v374_v14  }
  0x33   : > { %521 = vperm.xlu0 %1293, %v1070_v15  }
  0x35   : > { %394 = vperm.xlu1 %1295, %v376_v16  }
  0x37   : > { %646 = vperm.xlu0 %1293, %v1080_v17  }
  0x39   : > { %516 = vperm.xlu1 %1295, %v1069_v18  }
  0x3b   : > { %656 = vperm.xlu0 %1293, %v1082_v19  }
  0x3d   : > { %526 = vperm.xlu1 %1295, %v1071_v20  }
  0x3f   : > { %777 = vperm.xlu0 %1293, %v1092_v21  }
  0x41   : > { %651 = vperm.xlu1 %1295, %v1081_v22  }
  0x43   : > { %787 = vperm.xlu0 %1293, %v1094_v24   ;;  %v1066_v24 = vld [vmem:[%s1724_s3 + $0x30] sm:$0xff] }
  0x45   : > { %661 = vperm.xlu1 %1295, %v1083_v25   ;;  %v1067_v25 = vld [vmem:[%s1724_s3 + $0x38] sm:$0xff] }
  0x47   : > { %904 = vperm.xlu0 %1293, %v901_v26   ;;  %v1076_v26 = vld [vmem:[%s1724_s3 + $0x40] sm:$0xff] }
  0x49   : > { %782 = vperm.xlu1 %1295, %v1093_v27  }
  0x4d   : > { %792 = vperm.xlu1 %1295, %v1095_v28  }
  0x91   : > { %v311_v29 = vpop.permute.xlu1 %310  ;;  %v319_v30 = vpop.permute.xlu0 %318 }
  0x92   : > { %v329_v42 = vmul.f32 %v1059_v37, %v311_v29  ;;  %v331_v50 = vmul.f32 %v1059_v37, %v319_v30 }
  0x95   : > { %v315_v31 = vpop.permute.xlu1 %314 }
  0x96   : > { %v284_v32 = vpop.permute.xlu0 %283  ;;  %v330_v39 = vmul.f32 %v1059_v37, %v315_v31 }
  0x97   : > { %v305_v40 = vmul.f32 %v1058_v35, %v284_v32 }
  0x99   : > { %v333_v46 = vadd.f32 %v329_v42, %v305_v40 }
  0x9a   : > { %v289_v33 = vpop.permute.xlu0 %288  ;;  %v299_v34 = vpop.permute.xlu1 %298 }
  0x9b   : > { %v306_v36 = vmul.f32 %v1058_v35, %v289_v33  ;;  %v308_v54 = vmul.f32 %v1058_v35, %v299_v34 }
  0x9d   : > { %v334_v43 = vadd.f32 %v330_v39, %v306_v36 }
  0x9e   : > { %v294_v38 = vpop.permute.xlu0 %293 }
  0x9f   : > { %v323_v41 = vpop.permute.xlu1 %322  ;;  %v307_v47 = vmul.f32 %v1058_v35, %v294_v38 }
  0xa0   : > { %v332_v51 = vmul.f32 %v1059_v37, %v323_v41 }
  0xa1   : > { %v335_v53 = vadd.f32 %v331_v50, %v307_v47  ;;  %v1078_v50 = vld [vmem:[%s1724_s3 + $0x50] sm:$0xff] }
  0xa2   : > { %v349_v44 = vpop.permute.xlu0 %348  ;;  %v336_v56 = vadd.f32 %v332_v51, %v308_v54  ;;  %v1079_v51 = vld [vmem:[%s1724_s3 + $0x58] sm:$0xff] }
  0xa3   : > { %v362_v45 = vadd.f32 %v349_v44, %v334_v43 }
  0xa4   : > { %v344_v48 = vpop.permute.xlu1 %343 }
  0xa5   : > { %v361_v49 = vadd.f32 %v344_v48, %v333_v46  ;;  %1296 = vtanh.f32 %v362_v45 }
  0xa6   : > { %v380_v6 = vpop.permute.xlu0 %379 }
  0xa7   : > { %1298 = vtanh.f32 %v361_v49  ;;  %v1077_v49 = vld [vmem:[%s1724_s3 + $0x48] sm:$0xff] }
  0xa8   : > { %v354_v52 = vpop.permute.xlu1 %353 }
  0xa9   : > { %v363_v55 = vadd.f32 %v354_v52, %v335_v53  ;;  %v1088_v52 = vld [vmem:[%s1724_s3 + $0x60] sm:$0xff] }
  0xaa   : > { %v390_v13 = vpop.permute.xlu0 %389 }
  0xab   : > { %1300 = vtanh.f32 %v363_v55 }
  0xac   : > { %v359_v57 = vpop.permute.xlu1 %358 }
  0xad   : > { %v364_v58 = vadd.f32 %v359_v57, %v336_v56 }
  0xae   : > { %v512_v28 = vpop.permute.xlu0 %511 }
  0xaf   : > { %1302 = vtanh.f32 %v364_v58  ;;  %v1578_v59 = vpop.eup %1296 }
  0xb0   : > { %v385_v5 = vpop.permute.xlu1 %384 }
  0xb1   : > { %v1580_v60 = vpop.eup %1298 }
  0xb2   : > { %v1208_v61 = vpack.c.bf16 %v1578_v59, %v1580_v60  ;;  %v522_v35 = vpop.permute.xlu0 %521 }
  0xb4   : > { %1209 = vmatprep.subr.bf16.mxu0 %v1208_v61  ;;  %v395_v11 = vpop.permute.xlu1 %394 }
  0xb5   : > { %1211 = vmatpush3.bf16.msra.mxu0 %v1208_v61  ;;  %v1584_v62 = vpop.eup %1300 }
  0xb6   : > { %v647_v54 = vpop.permute.xlu0 %646 }
  0xb8   : > { %v517_v27 = vpop.permute.xlu1 %516 }
  0xb9   : > { %v1586_v63 = vpop.eup %1302 }
  0xba   : > { %v1212_v0 = vpack.c.bf16 %v1586_v63, %v1584_v62  ;;  %v657_v61 = vpop.permute.xlu0 %656 }
  0xbc   : > { %1213 = vmatprep.subr.bf16.mxu0 %v1212_v0  ;;  %v527_v33 = vpop.permute.xlu1 %526 }
  0xbd   : > { %1215 = vmatpush3.bf16.msra.mxu0 %v1212_v0 }
  0xc0   : > { %1150 = vmatmul.mubr.msk.f32.vlgmr.msra.gmra.mrb[0].mxu0 %vm397_vm0, %v370_v1  ;;  %v652_v53 = vpop.permute.xlu1 %651 }
  0xc1   : > { %1152 = vmatprep.mubr.msk.f32.mxu0 %vm397_vm0, %v371_v2 }
  0xc4   : > { %1153 = vmatmul.mubr.msk.f32.gmra.mrb[2].mxu0 %vm397_vm0, %v372_v3 }
  0xc5   : > { %1177 = vmatprep.mubr.msk.f32.mxu0 %vm397_vm0, %v1076_v26 }
 0x193   : > { %v1151_v7 = vpop.f32.mrb[0].mxu0 }
 0x194   : > { %v482_v8 = vadd.f32 %v1151_v7, %v385_v5  ;;  %v476_v9 = vpop.f32.mrb[1].mxu0  ;;  %v1089_v7 = vld [vmem:[%s1724_s3 + $0x68] sm:$0xff] }
 0x195   : > { %v477_v10 = vadd.f32 %v476_v9, %v380_v6  ;;  %v1091_v9 = vld [vmem:[%s1724_s3 + $0x78] sm:$0xff] }
 0x196   : > { %1304 = vtanh.f32 %v482_v8  ;;  %v1090_v8 = vld [vmem:[%s1724_s3 + $0x70] sm:$0xff] }
 0x197   : > { %1306 = vtanh.f32 %v477_v10  ;;  %v1154_v12 = vpop.f32.mrb[2].mxu0  ;;  %v1402_v10 = vmov 0.0|0.0  }
 0x198   : > { %v492_v14 = vadd.f32 %v1154_v12, %v395_v11  ;;  %v486_v15 = vpop.f32.mrb[3].mxu0  ;;  %v1404_v11 = vmov 0.0  }
 0x199   : > { %v487_v16 = vadd.f32 %v486_v15, %v390_v13  ;;  %v778_v13 = vpop.permute.xlu0 %777 }
 0x19a   : > { %1308 = vtanh.f32 %v492_v14 }
 0x19b   : > { %1310 = vtanh.f32 %v487_v16 }
 0x1a0   : > { %v1305_v17 = vpop.eup %1304 }
 0x1a1   : > { %v1307_v18 = vpop.eup %1306 }
 0x1a2   : > { %v1216_v19 = vpack.c.bf16 %v1305_v17, %v1307_v18 }
 0x1a4   : > { %v1309_v20 = vpop.eup %1308  ;;  %1217 = vmatprep.subr.bf16.mxu1 %v1216_v19 }
 0x1a5   : > { %v1311_v21 = vpop.eup %1310  ;;  %1219 = vmatpush3.bf16.msra.mxu1 %v1216_v19 }
 0x1a6   : > { %v1220_v22 = vpack.c.bf16 %v1309_v20, %v1311_v21  ;;  %v788_v20 = vpop.permute.xlu0 %787 }
 0x1a8   : > { %1221 = vmatprep.subr.bf16.mxu1 %v1220_v22 }
 0x1a9   : > { %1223 = vmatpush3.bf16.msra.mxu1 %v1220_v22 }
 0x1ac   : > { %1164 = vmatmul.mubr.msk.f32.vlgmr.msra.gmra.mrb[0].mxu1 %vm397_vm0, %v1065_v23 }
 0x1ad   : > { %1166 = vmatprep.mubr.msk.f32.mxu1 %vm397_vm0, %v1066_v24 }
 0x1b0   : > { %1167 = vmatmul.mubr.msk.f32.gmra.mrb[2].mxu1 %vm397_vm0, %v1067_v25 }
 0x1b1   : > { %1191 = vmatprep.mubr.msk.f32.mxu1 %vm397_vm0, %v1088_v52 }
 0x27f   : > { %v1165_v29 = vpop.f32.mrb[0].mxu1 }
 0x280   : > { %v613_v30 = vadd.f32 %v1165_v29, %v517_v27  ;;  %v607_v31 = vpop.f32.mrb[1].mxu1 }
 0x281   : > { %v608_v32 = vadd.f32 %v607_v31, %v512_v28 }
 0x282   : > { %1312 = vtanh.f32 %v613_v30 }
 0x283   : > { %1314 = vtanh.f32 %v608_v32  ;;  %v1168_v34 = vpop.f32.mrb[2].mxu1 }
 0x284   : > { %v623_v36 = vadd.f32 %v1168_v34, %v527_v33  ;;  %v617_v37 = vpop.f32.mrb[3].mxu1  ;;  %v900_v34 = vld [vmem:[%s1726_s5] sm:$0x1] }
 0x285   : > { %v618_v38 = vadd.f32 %v617_v37, %v522_v35  ;;  %v907_v35 = vlaneseq }
 0x286   : > { %1316 = vtanh.f32 %v623_v36 }
 0x287   : > { %1318 = vtanh.f32 %v618_v38  ;;  %v908_v36 = vshrl.u32 %v907_v35, 7  ;;  %v905_v38 = vpop.permute.xlu0 %904 }
 0x289   : > { %v909_v37 = vsub.s32 0, %v908_v36 }
 0x28c   : > { %v1313_v39 = vpop.eup %1312 }
 0x28d   : > { %v1315_v40 = vpop.eup %1314  ;;  %v1623_v41 = vadd.f32 %v1313_v39, %v1578_v59  ;;  %v662_v59 = vpop.permute.xlu1 %661  ;;  %v910_v39 = vrot.slane %v905_v38, %v909_v37 }
 0x28e   : > { %v1626_v42 = vadd.f32 %v1315_v40, %v1580_v60 }
 0x290   : > { %v1317_v43 = vpop.eup %1316  ;;  %v1224_v44 = vpack.c.bf16 %v1623_v41, %v1626_v42 }
 0x291   : > { %v1319_v45 = vpop.eup %1318  ;;  %v1631_v46 = vadd.f32 %v1317_v43, %v1586_v63  ;;  %v783_v12 = vpop.permute.xlu1 %782 }
 0x292   : > { %1225 = vmatprep.subr.bf16.mxu0 %v1224_v44  ;;  %v1634_v47 = vadd.f32 %v1319_v45, %v1584_v62 }
 0x293   : > { %1227 = vmatpush3.bf16.msra.mxu0 %v1224_v44 }
 0x294   : > { %v1228_v48 = vpack.c.bf16 %v1631_v46, %v1634_v47 }
 0x295   : > { %v793_v18 = vpop.permute.xlu1 %792 }
 0x296   : > { %1229 = vmatprep.subr.bf16.mxu0 %v1228_v48 }
 0x297   : > { %1231 = vmatpush3.bf16.msra.mxu0 %v1228_v48 }
 0x298   : > { %1240 = vmatprep.subr.bf16.mxu0 %v1402_v10 }
 0x29a   : > { %1178 = vmatmul.mubr.msk.f32.vlgmr.msra.gmra.mrb[4].mxu0 %vm397_vm0, %v1077_v49 }
 0x29b   : > { %1180 = vmatprep.mubr.msk.f32.mxu0 %vm397_vm0, %v1078_v50 }
 0x29e   : > { %1181 = vmatmul.mubr.msk.f32.gmra.mrb[6].mxu0 %vm397_vm0, %v1079_v51 }
 0x29f   : > { %1205 = vmatprep.mubr.msk.f32.mxu0 %vm1403_vm1, %v1404_v11 }
 0x36d   : > { %v1179_v55 = vpop.f32.mrb[4].mxu0 }
 0x36e   : > { %v748_v56 = vadd.f32 %v1179_v55, %v652_v53  ;;  %v742_v57 = vpop.f32.mrb[5].mxu0 }
 0x36f   : > { %v743_v58 = vadd.f32 %v742_v57, %v647_v54 }
 0x370   : > { %1320 = vtanh.f32 %v748_v56 }
 0x371   : > { %1322 = vtanh.f32 %v743_v58  ;;  %v1182_v60 = vpop.f32.mrb[6].mxu0 }
 0x372   : > { %v758_v62 = vadd.f32 %v1182_v60, %v662_v59  ;;  %v752_v63 = vpop.f32.mrb[7].mxu0 }
 0x373   : > { %v753_v0 = vadd.f32 %v752_v63, %v657_v61 }
 0x374   : > { %1324 = vtanh.f32 %v758_v62 }
 0x375   : > { %1326 = vtanh.f32 %v753_v0 }
 0x37a   : > { %v1321_v1 = vpop.eup %1320 }
 0x37b   : > { %v1323_v2 = vpop.eup %1322 }
 0x37c   : > { %v1232_v3 = vpack.c.bf16 %v1321_v1, %v1323_v2 }
 0x37e   : > { %v1325_v4 = vpop.eup %1324  ;;  %1233 = vmatprep.subr.bf16.mxu1 %v1232_v3 }
 0x37f   : > { %v1327_v5 = vpop.eup %1326  ;;  %1235 = vmatpush3.bf16.msra.mxu1 %v1232_v3 }
 0x380   : > { %v1236_v6 = vpack.c.bf16 %v1325_v4, %v1327_v5 }
 0x382   : > { %1237 = vmatprep.subr.bf16.mxu1 %v1236_v6 }
 0x383   : > { %1239 = vmatpush3.bf16.msra.mxu1 %v1236_v6 }
 0x386   : > { %1192 = vmatmul.mubr.msk.f32.vlgmr.msra.gmra.mrb[4].mxu1 %vm397_vm0, %v1089_v7 }
 0x387   : > { %1194 = vmatprep.mubr.msk.f32.mxu1 %vm397_vm0, %v1090_v8 }
 0x38a   : > { %1195 = vmatmul.mubr.msk.f32.gmra.mrb[6].mxu1 %vm397_vm0, %v1091_v9 }
 0x459   : > { %v1193_v14 = vpop.f32.mrb[4].mxu1 }
 0x45a   : > { %v879_v15 = vadd.f32 %v1193_v14, %v783_v12  ;;  %v873_v16 = vpop.f32.mrb[5].mxu1 }
 0x45b   : > { %v874_v17 = vadd.f32 %v873_v16, %v778_v13 }
 0x45c   : > { %1328 = vtanh.f32 %v879_v15 }
 0x45d   : > { %1330 = vtanh.f32 %v874_v17  ;;  %v1196_v19 = vpop.f32.mrb[6].mxu1 }
 0x45e   : > { %v889_v21 = vadd.f32 %v1196_v19, %v793_v18  ;;  %v883_v22 = vpop.f32.mrb[7].mxu1 }
 0x45f   : > { %v884_v23 = vadd.f32 %v883_v22, %v788_v20 }
 0x460   : > { %1332 = vtanh.f32 %v889_v21 }
 0x461   : > { %1334 = vtanh.f32 %v884_v23 }
 0x466   : > { %v1329_v24 = vpop.eup %1328 }
 0x467   : > { %v1331_v25 = vpop.eup %1330  ;;  %v897_v26 = vadd.f32 %v1329_v24, %v1623_v41 }
 0x468   : > { %v896_v27 = vadd.f32 %v1331_v25, %v1626_v42 }
 0x46a   : > { %v1333_v28 = vpop.eup %1332  ;;  %v1241_v29 = vpack.c.bf16 %v897_v26, %v896_v27 }
 0x46b   : > { %v1335_v30 = vpop.eup %1334  ;;  %v899_v31 = vadd.f32 %v1333_v28, %v1631_v46 }
 0x46c   : > { %1242 = vmatpush3.bf16.msra.mxu0 %v1241_v29  ;;  %v898_v32 = vadd.f32 %v1335_v30, %v1634_v47 }
 0x46d   : > { %1243 = vmatprep.subr.bf16.mxu0 %v1402_v10 }
 0x46e   : > { %v1244_v33 = vpack.c.bf16 %v899_v31, %v898_v32 }
 0x470   : > { %1245 = vmatpush3.bf16.msra.mxu0 %v1244_v33 }
 0x473   : > { %1206 = vmatmul.mubr.msk.f32.vlgmr.msra.gmra.mrb[8].mxu0 %vm397_vm0, %v900_v34 }
 0x546   : > { %v980_v40 = vpop.f32.mrb[8].mxu0 }
 0x547   : > { %v981_v41 = vadd.f32 %v980_v40, %v910_v39  ;;  %v1207_v42 = vpop.f32.mrb[9].mxu0 }
 0x549   : > { %984 = vst [vmem:[%s270_s10] sm:$0x1] %v981_v41 }
 0x54a   : > { %1349 = shalt.err (!%p1346_p3)
}
 0x54b   : > { %s1350_s22 = scalar_lea.hbm %s1679_s17, 16  ;;  %s1354_s25 = scalar_lea.hbm %s1728_s7, 32 }
 0x54c   : > { %p1351_p4 = scmp.ne.s32.totalorder %s1679_s17, %s1350_s22  ;;  %p1355_p9 = scmp.lt.u32.totalorder %s1679_s17, %s1728_s7 }
 0x54d   : > { %p1356_p10 = scmp.lt.u32.totalorder %s1354_s25, %s1350_s22  ;;  %p1358_p12 = scmp.lt.u32.totalorder %s1350_s22, %s1679_s17 }
 0x54e   : > { %p1352_p7 = pnand %p1351_p4, %p1487_p5 }
 0x54f   : > { %p1357_p11 = por %p1356_p10, %p1355_p9 }
 0x550   : > { %p1353_p8 = pneg %p1352_p7 }
 0x551   : > { %p1359_p13 = por %p1358_p12, %p1357_p11 }
 0x553   : > { %p1360_p0 = pnand %p1359_p13, %p1353_p8 }
 0x555   : > { %1363 = shalt.err (!%p1360_p0)
}
 0x556   : > { %1246 = dma.vmem_to_hbm [thread:$0]  (%p1487_p5), %s1681_s14, 16, %s1679_s17, %s986_s18  }
 0x557 PF: > { %p1252_p1 = scmp.ge.s32.totalorder %s1398_s29, 2  ;;  %s1010_s10 = sand.u32 1, %s1386_s26  }
 0x558   : > { %s1011_s15 = scalar_lea.sflag [#allocation4], %s1010_s10 }
 0x559   : > { %p1249_p2 = pnand %p1252_p1, %p1491_p6 }
 0x55b   : > { %1381 = dma.done.wait (!%p1249_p2), %s1011_s15, 16  }
 0x55c   : > { %1383 = vsyncadd (!%p1249_p2), %s1011_s15, 4294967280  ;;  %p19_p3 = scmp.ge.s32.totalorder %s1474_s8, 4   ;;  %s1731_s26 = smov %s1390_s27 }
 0x55d   : > { %s1732_s27 = smov %s1394_s28  ;;  %s1733_s28 = smov %s1485_s11 }
 0x55e   : > { %s1734_s29 = smov %s1474_s8  ;;  %21 = sbr.rel (!%p19_p3) target bundleno = 6 (0x6), region = 89 }
 0x565   :  { %1015 = vsyncpa [#allocation4], 1 }
 0x566   :  { %1017 = vsyncpa [#allocation4 + $0x1], 1 }

</bundles_post_ra>
